<compile_context>
chip_gen: v7x
topology: tpu7x:2x2x1
jax: 0.10.0
libtpu: 0.0.40
codegen_flags: <defaults>
</compile_context>

<pallas_src>
import functools

import jax
import jax.numpy as jnp
import numpy as np
from jax import lax
from jax.experimental import pallas as pl
from jax.experimental.pallas import tpu as pltpu


def _head_flash_kernel(xq_ref, xkv_ref, w_ref, o_ref,
                       m_sc, l_sc, acc_sc, q_sc, *, scale, head_size, tq, tk):
    """One (batch, q-block, kv-block) grid step of a single attention head.

    xq_ref : (1, tq, C)  query-side activations
    xkv_ref: (1, tk, C)  key/value-side activations (same array, kv tiling)
    w_ref  : (C, 3H)     fused [Wq | Wk | Wv]
    o_ref  : (1, tq, H)  output block (resident across the kv grid axis)
    """
    qi = pl.program_id(1)
    ki = pl.program_id(2)
    H = head_size

    @pl.when(ki == 0)
    def _init():
        m_sc[...] = jnp.full(m_sc.shape, -jnp.inf, dtype=m_sc.dtype)
        l_sc[...] = jnp.zeros(l_sc.shape, dtype=l_sc.dtype)
        acc_sc[...] = jnp.zeros(acc_sc.shape, dtype=acc_sc.dtype)
        # Project q once per q-block; reused across every kv block.
        xq = xq_ref[0]                                                     # (tq, C)
        q = lax.dot_general(xq, w_ref[:, :H], (((1,), (0,)), ((), ())),
                            preferred_element_type=jnp.float32) * scale    # (tq, H)
        q_sc[...] = q.astype(q_sc.dtype)

    # Skip kv blocks that lie entirely above the causal diagonal.
    @pl.when(ki * tk <= qi * tq + (tq - 1))
    def _compute():
        xkv = xkv_ref[0]        # (tk, C)
        cdt = xkv.dtype         # MXU operand dtype (bf16 fast path if caller uses bf16)

        # K/V projections: native-dtype operands, f32 accumulation.
        kv = lax.dot_general(xkv, w_ref[:, H:], (((1,), (0,)), ((), ())),
                             preferred_element_type=jnp.float32)           # (tk, 2H)
        k = kv[:, :H]
        v = kv[:, H:]

        # Scores: contract last dims directly (no explicit transpose of k).
        s = lax.dot_general(q_sc[...], k.astype(cdt),
                            (((1,), (1,)), ((), ())),
                            preferred_element_type=jnp.float32)            # (tq, tk)

        # Causal mask, offset by block indices: only (tq, tk) iotas per step.
        row = lax.broadcasted_iota(jnp.int32, (tq, tk), 0) + qi * tq
        col = lax.broadcasted_iota(jnp.int32, (tq, tk), 1) + ki * tk
        s = jnp.where(col <= row, s, -jnp.inf)

        # Online softmax update (f32 on the VPU; v5e-friendly).
        m_prev = m_sc[...]                                                 # (tq, 1)
        m_new = jnp.maximum(m_prev, jnp.max(s, axis=-1, keepdims=True))
        alpha = jnp.exp(m_prev - m_new)
        p = jnp.exp(s - m_new)                                             # (tq, tk)
        l_sc[...] = alpha * l_sc[...] + jnp.sum(p, axis=-1, keepdims=True)
        acc_sc[...] = alpha * acc_sc[...] + lax.dot_general(
            p.astype(cdt), v.astype(cdt), (((1,), (0,)), ((), ())),
            preferred_element_type=jnp.float32)                            # (tq, H)
        m_sc[...] = m_new

    @pl.when(ki == pl.num_programs(2) - 1)
    def _finalize():
        # Exact division (not approx reciprocal) to stay within tight tolerances.
        o_ref[0] = (acc_sc[...] / l_sc[...]).astype(o_ref.dtype)


def head_forward(x, wq, wk, wv, *, tq=None, tk=None):
    """x: (B, T, C); wq/wk/wv: (C, H) (transposed PyTorch weights). Returns (B, T, H)."""
    B, T, C = x.shape
    H = wq.shape[1]
    scale = float(C) ** -0.5          # matches the module: scaled by embedding dim C

    if tq is None:
        tq = T if T <= 128 else 128
    if tk is None:
        tk = T if T <= 128 else 128
    assert T % tq == 0 and T % tk == 0, "T must be divisible by tq / tk"

    # Fuse the three projection weights into one (C, 3H) operand: one wide MXU
    # push per grid step instead of three narrow ones, and a single weight DMA.
    w_qkv = jnp.concatenate([wq, wk, wv], axis=1)

    nq = T // tq
    nk = T // tk

    kernel = functools.partial(_head_flash_kernel, scale=scale,
                               head_size=H, tq=tq, tk=tk)

    itemsize = jnp.dtype(x.dtype).itemsize
    cost = pl.CostEstimate(
        flops=2 * B * (3 * T * C * H + 2 * T * T * H),
        transcendentals=B * T * T,
        bytes_accessed=(2 * B * T * C + C * 3 * H + B * T * H) * itemsize,
    )

    return pl.pallas_call(
        kernel,
        out_shape=jax.ShapeDtypeStruct((B, T, H), x.dtype),
        grid_spec=pltpu.PrefetchScalarGridSpec(
            num_scalar_prefetch=0,
            grid=(B, nq, nk),
            in_specs=[
                pl.BlockSpec((1, tq, C), lambda b, qi, ki: (b, qi, 0)),   # x, q tiling
                pl.BlockSpec((1, tk, C), lambda b, qi, ki: (b, ki, 0)),   # x, kv tiling
                pl.BlockSpec((C, 3 * H), lambda b, qi, ki: (0, 0)),       # fused weights
            ],
            out_specs=pl.BlockSpec((1, tq, H), lambda b, qi, ki: (b, qi, 0)),
            scratch_shapes=[
                pltpu.VMEM((tq, 1), jnp.float32),   # running max m_i
                pltpu.VMEM((tq, 1), jnp.float32),   # running denom l_i
                pltpu.VMEM((tq, H), jnp.float32),   # output accumulator
                pltpu.VMEM((tq, H), x.dtype),       # cached scaled q projection
            ],
        ),
        compiler_params=pltpu.CompilerParams(
            dimension_semantics=("parallel", "parallel", "arbitrary")),
        cost_estimate=cost,
    )(x, x, w_qkv)


def head_reference(x, wq, wk, wv):
    """Pure-JAX reference mirroring the PyTorch forward (eval mode)."""
    B, T, C = x.shape
    q = x @ wq
    k = x @ wk
    v = x @ wv
    w = (q @ jnp.swapaxes(k, -2, -1)) * (C ** -0.5)
    mask = jnp.tril(jnp.ones((T, T), dtype=bool))
    w = jnp.where(mask, w, -jnp.inf)
    w = jax.nn.softmax(w, axis=-1)
    return w @ v


if __name__ == "__main__":
    # Config consistent with the module: embedding_dim=32, head_size=16, batch=2.
    B, C, H = 2, 32, 16

    key = jax.random.PRNGKey(0)
    kx, kq, kk, kv = jax.random.split(key, 4)

    # Deterministic "Linear(bias=False)" weights, stored as (C, H).
    wq = jax.random.normal(kq, (C, H), dtype=jnp.float32) * (C ** -0.5)
    wk = jax.random.normal(kk, (C, H), dtype=jnp.float32) * (C ** -0.5)
    wv = jax.random.normal(kv, (C, H), dtype=jnp.float32) * (C ** -0.5)

    # Case 1: block_size == T == 8 (single tile).
    T1 = 8
    x1 = jax.random.normal(kx, (B, T1, C), dtype=jnp.float32)
    out1 = jax.block_until_ready(head_forward(x1, wq, wk, wv))
    ref1 = head_reference(x1, wq, wk, wv)
    np.testing.assert_allclose(np.asarray(out1), np.asarray(ref1),
                               rtol=2e-3, atol=2e-3)

    # Case 2: T=32 with tq=tk=8 -> exercises the multi-block online softmax
    # and the causal kv-block skipping.
    T2 = 32
    x2 = jax.random.normal(kx, (B, T2, C), dtype=jnp.float32)
    out2 = jax.block_until_ready(head_forward(x2, wq, wk, wv, tq=8, tk=8))
    ref2 = head_reference(x2, wq, wk, wv)
    np.testing.assert_allclose(np.asarray(out2), np.asarray(ref2),
                               rtol=2e-3, atol=2e-3)

    print("KERNEL_OK")
</pallas_src>

<mosaic_0001>
module attributes {stable_mosaic.version = 11 : i64} {
  func.func @_head_flash_kernel(%arg0: i32, %arg1: i32, %arg2: i32, %arg3: memref<1x8x32xf32, #tpu.memory_space<vmem>>, %arg4: memref<1x8x32xf32, #tpu.memory_space<vmem>>, %arg5: memref<32x48xf32, #tpu.memory_space<vmem>>, %arg6: memref<1x8x16xf32, #tpu.memory_space<vmem>>, %arg7: memref<8x1xf32, #tpu.memory_space<vmem>>, %arg8: memref<8x1xf32, #tpu.memory_space<vmem>>, %arg9: memref<8x16xf32, #tpu.memory_space<vmem>>, %arg10: memref<8x16xf32, #tpu.memory_space<vmem>>) attributes {dimension_semantics = [#tpu.dimension_semantics<parallel>, #tpu.dimension_semantics<parallel>, #tpu.dimension_semantics<arbitrary>], iteration_bounds = array<i64: 2, 1, 1>, scalar_prefetch = 0 : i64, scratch_operands = 4 : i64, tpu.core_type = #tpu.core_type<tc>, window_params = [{transform_indices = @transform_0, window_bounds = array<i64: 1, 8, 32>}, {transform_indices = @transform_1, window_bounds = array<i64: 1, 8, 32>}, {pipeline_mode = #tpu.pipeline_mode<synchronous>, transform_indices = @transform_2, window_bounds = array<i64: 32, 48>}, {transform_indices = @transform_3, window_bounds = array<i64: 1, 8, 16>}]} {
    %c0_i32 = arith.constant 0 : i32
    %0 = arith.cmpi eq, %arg2, %c0_i32 : i32
    %1 = arith.extui %0 : i1 to i32
    %c0_i32_0 = arith.constant 0 : i32
    %2 = arith.cmpi ne, %1, %c0_i32_0 : i32
    scf.if %2 {
      %cst = arith.constant 0xFF800000 : f32
      %12 = vector.broadcast %cst : f32 to vector<8x1xf32>
      %c0 = arith.constant 0 : index
      %c0_5 = arith.constant 0 : index
      %13 = vector.load %arg7[%c0, %c0_5] : memref<8x1xf32, #tpu.memory_space<vmem>>, vector<8x1xf32>
      tpu.vector_store %arg7[%c0, %c0_5], %12 {strides = array<i32>} : memref<8x1xf32, #tpu.memory_space<vmem>>, vector<8x1xf32>,
      %cst_6 = arith.constant 0.000000e+00 : f32
      %14 = vector.broadcast %cst_6 : f32 to vector<8x1xf32>
      %c0_7 = arith.constant 0 : index
      %c0_8 = arith.constant 0 : index
      %15 = vector.load %arg8[%c0_7, %c0_8] : memref<8x1xf32, #tpu.memory_space<vmem>>, vector<8x1xf32>
      tpu.vector_store %arg8[%c0_7, %c0_8], %14 {strides = array<i32>} : memref<8x1xf32, #tpu.memory_space<vmem>>, vector<8x1xf32>,
      %cst_9 = arith.constant 0.000000e+00 : f32
      %16 = vector.broadcast %cst_9 : f32 to vector<8x16xf32>
      %c0_10 = arith.constant 0 : index
      %c0_11 = arith.constant 0 : index
      %17 = vector.load %arg9[%c0_10, %c0_11] : memref<8x16xf32, #tpu.memory_space<vmem>>, vector<8x16xf32>
      tpu.vector_store %arg9[%c0_10, %c0_11], %16 {strides = array<i32>} : memref<8x16xf32, #tpu.memory_space<vmem>>, vector<8x16xf32>,
      %c0_12 = arith.constant 0 : index
      %c0_13 = arith.constant 0 : index
      %c0_14 = arith.constant 0 : index
      %18 = vector.load %arg3[%c0_12, %c0_13, %c0_14] : memref<1x8x32xf32, #tpu.memory_space<vmem>>, vector<1x8x32xf32>
      %19 = vector.shape_cast %18 : vector<1x8x32xf32> to vector<8x32xf32>
      %c0_15 = arith.constant 0 : index
      %c0_16 = arith.constant 0 : index
      %20 = vector.load %arg5[%c0_15, %c0_16] : memref<32x48xf32, #tpu.memory_space<vmem>>, vector<32x16xf32>
      %cst_17 = arith.constant dense<0.000000e+00> : vector<8x16xf32>
      %21 = tpu.matmul %19, %20, %cst_17 {dimension_numbers = #tpu.dot_dimension_numbers<[1], [0], [0], [1], [0, 0, 1, 1], [], []>} : vector<8x32xf32>, vector<32x16xf32>, vector<8x16xf32> -> vector<8x16xf32>
      %cst_18 = arith.constant 0.176776692 : f32
      %22 = vector.broadcast %cst_18 : f32 to vector<8x16xf32>
      %23 = arith.mulf %21, %22 : vector<8x16xf32>
      %c0_19 = arith.constant 0 : index
      %c0_20 = arith.constant 0 : index
      %24 = vector.load %arg10[%c0_19, %c0_20] : memref<8x16xf32, #tpu.memory_space<vmem>>, vector<8x16xf32>
      tpu.vector_store %arg10[%c0_19, %c0_20], %23 {strides = array<i32>} : memref<8x16xf32, #tpu.memory_space<vmem>>, vector<8x16xf32>,
    } else {
    }
    %c8_i32 = arith.constant 8 : i32
    %3 = arith.muli %arg2, %c8_i32 : i32
    %c8_i32_1 = arith.constant 8 : i32
    %4 = arith.muli %arg1, %c8_i32_1 : i32
    %c7_i32 = arith.constant 7 : i32
    %5 = arith.addi %4, %c7_i32 : i32
    %6 = arith.cmpi sle, %3, %5 : i32
    %7 = arith.extui %6 : i1 to i32
    %c0_i32_2 = arith.constant 0 : i32
    %8 = arith.cmpi ne, %7, %c0_i32_2 : i32
    scf.if %8 {
      %c0 = arith.constant 0 : index
      %c0_5 = arith.constant 0 : index
      %c0_6 = arith.constant 0 : index
      %12 = vector.load %arg4[%c0, %c0_5, %c0_6] : memref<1x8x32xf32, #tpu.memory_space<vmem>>, vector<1x8x32xf32>
      %13 = vector.shape_cast %12 : vector<1x8x32xf32> to vector<8x32xf32>
      %c0_7 = arith.constant 0 : index
      %c16 = arith.constant 16 : index
      %14 = vector.load %arg5[%c0_7, %c16] : memref<32x48xf32, #tpu.memory_space<vmem>>, vector<32x32xf32>
      %cst = arith.constant dense<0.000000e+00> : vector<8x32xf32>
      %15 = tpu.matmul %13, %14, %cst {dimension_numbers = #tpu.dot_dimension_numbers<[1], [0], [0], [1], [0, 0, 1, 1], [], []>} : vector<8x32xf32>, vector<32x32xf32>, vector<8x32xf32> -> vector<8x32xf32>
      %16 = vector.extract_strided_slice %15 {offsets = [0, 0], sizes = [8, 16], strides = [1, 1]} : vector<8x32xf32> to vector<8x16xf32>
      %17 = vector.extract_strided_slice %15 {offsets = [0, 16], sizes = [8, 16], strides = [1, 1]} : vector<8x32xf32> to vector<8x16xf32>
      %c0_8 = arith.constant 0 : index
      %c0_9 = arith.constant 0 : index
      %18 = vector.load %arg10[%c0_8, %c0_9] : memref<8x16xf32, #tpu.memory_space<vmem>>, vector<8x16xf32>
      %cst_10 = arith.constant dense<0.000000e+00> : vector<8x8xf32>
      %19 = tpu.matmul %18, %16, %cst_10 {dimension_numbers = #tpu.dot_dimension_numbers<[1], [1], [0], [0], [0, 0, 1, 0], [], []>} : vector<8x16xf32>, vector<8x16xf32>, vector<8x8xf32> -> vector<8x8xf32>
      %20 = tpu.iota {dimensions = array<i32: 0>} : vector<8x8xi32>
      %c8_i32_11 = arith.constant 8 : i32
      %21 = arith.muli %arg1, %c8_i32_11 : i32
      %22 = vector.broadcast %21 : i32 to vector<8x8xi32>
      %23 = arith.addi %20, %22 : vector<8x8xi32>
      %24 = tpu.iota {dimensions = array<i32: 1>} : vector<8x8xi32>
      %c8_i32_12 = arith.constant 8 : i32
      %25 = arith.muli %arg2, %c8_i32_12 : i32
      %26 = vector.broadcast %25 : i32 to vector<8x8xi32>
      %27 = arith.addi %24, %26 : vector<8x8xi32>
      %28 = arith.cmpi sle, %27, %23 : vector<8x8xi32>
      %cst_13 = arith.constant 0xFF800000 : f32
      %29 = vector.broadcast %cst_13 : f32 to vector<8x8xf32>
      %30 = arith.select %28, %19, %29 : vector<8x8xi1>, vector<8x8xf32>
      %c0_14 = arith.constant 0 : index
      %c0_15 = arith.constant 0 : index
      %31 = vector.load %arg7[%c0_14, %c0_15] : memref<8x1xf32, #tpu.memory_space<vmem>>, vector<8x1xf32>
      %cst_16 = arith.constant dense<0xFF800000> : vector<8xf32>
      %32 = vector.multi_reduction <maximumf>, %30, %cst_16 [1] : vector<8x8xf32> to vector<8xf32>
      %33 = vector.shape_cast %32 : vector<8xf32> to vector<8x1xf32>
      %34 = arith.maximumf %31, %33 : vector<8x1xf32>
      %35 = arith.subf %31, %34 : vector<8x1xf32>
      %36 = math.exp %35 : vector<8x1xf32>
      %37 = vector.broadcast %34 : vector<8x1xf32> to vector<8x8xf32>
      %38 = arith.subf %30, %37 : vector<8x8xf32>
      %39 = math.exp %38 : vector<8x8xf32>
      %c0_17 = arith.constant 0 : index
      %c0_18 = arith.constant 0 : index
      %40 = vector.load %arg8[%c0_17, %c0_18] : memref<8x1xf32, #tpu.memory_space<vmem>>, vector<8x1xf32>
      %41 = arith.mulf %36, %40 : vector<8x1xf32>
      %cst_19 = arith.constant dense<0.000000e+00> : vector<8xf32>
      %42 = vector.multi_reduction <add>, %39, %cst_19 [1] : vector<8x8xf32> to vector<8xf32>
      %43 = vector.shape_cast %42 : vector<8xf32> to vector<8x1xf32>
      %44 = arith.addf %41, %43 : vector<8x1xf32>
      %c0_20 = arith.constant 0 : index
      %c0_21 = arith.constant 0 : index
      %45 = vector.load %arg8[%c0_20, %c0_21] : memref<8x1xf32, #tpu.memory_space<vmem>>, vector<8x1xf32>
      tpu.vector_store %arg8[%c0_20, %c0_21], %44 {strides = array<i32>} : memref<8x1xf32, #tpu.memory_space<vmem>>, vector<8x1xf32>,
      %c0_22 = arith.constant 0 : index
      %c0_23 = arith.constant 0 : index
      %46 = vector.load %arg9[%c0_22, %c0_23] : memref<8x16xf32, #tpu.memory_space<vmem>>, vector<8x16xf32>
      %47 = vector.broadcast %36 : vector<8x1xf32> to vector<8x16xf32>
      %48 = arith.mulf %47, %46 : vector<8x16xf32>
      %cst_24 = arith.constant dense<0.000000e+00> : vector<8x16xf32>
      %49 = tpu.matmul %39, %17, %cst_24 {dimension_numbers = #tpu.dot_dimension_numbers<[1], [0], [0], [1], [0, 0, 1, 1], [], []>} : vector<8x8xf32>, vector<8x16xf32>, vector<8x16xf32> -> vector<8x16xf32>
      %50 = arith.addf %48, %49 : vector<8x16xf32>
      %c0_25 = arith.constant 0 : index
      %c0_26 = arith.constant 0 : index
      %51 = vector.load %arg9[%c0_25, %c0_26] : memref<8x16xf32, #tpu.memory_space<vmem>>, vector<8x16xf32>
      tpu.vector_store %arg9[%c0_25, %c0_26], %50 {strides = array<i32>} : memref<8x16xf32, #tpu.memory_space<vmem>>, vector<8x16xf32>,
      %c0_27 = arith.constant 0 : index
      %c0_28 = arith.constant 0 : index
      %52 = vector.load %arg7[%c0_27, %c0_28] : memref<8x1xf32, #tpu.memory_space<vmem>>, vector<8x1xf32>
      tpu.vector_store %arg7[%c0_27, %c0_28], %34 {strides = array<i32>} : memref<8x1xf32, #tpu.memory_space<vmem>>, vector<8x1xf32>,
    } else {
    }
    %c0_i32_3 = arith.constant 0 : i32
    %9 = arith.cmpi eq, %arg2, %c0_i32_3 : i32
    %10 = arith.extui %9 : i1 to i32
    %c0_i32_4 = arith.constant 0 : i32
    %11 = arith.cmpi ne, %10, %c0_i32_4 : i32
    scf.if %11 {
      %c0 = arith.constant 0 : index
      %c0_5 = arith.constant 0 : index
      %12 = vector.load %arg9[%c0, %c0_5] : memref<8x16xf32, #tpu.memory_space<vmem>>, vector<8x16xf32>
      %c0_6 = arith.constant 0 : index
      %c0_7 = arith.constant 0 : index
      %13 = vector.load %arg8[%c0_6, %c0_7] : memref<8x1xf32, #tpu.memory_space<vmem>>, vector<8x1xf32>
      %14 = vector.broadcast %13 : vector<8x1xf32> to vector<8x16xf32>
      %15 = arith.divf %12, %14 : vector<8x16xf32>
      %c0_8 = arith.constant 0 : index
      %c0_9 = arith.constant 0 : index
      %c0_10 = arith.constant 0 : index
      %16 = vector.load %arg6[%c0_8, %c0_9, %c0_10] : memref<1x8x16xf32, #tpu.memory_space<vmem>>, vector<1x8x16xf32>
      %17 = vector.shape_cast %16 : vector<1x8x16xf32> to vector<8x16xf32>
      %18 = vector.shape_cast %15 : vector<8x16xf32> to vector<1x8x16xf32>
      tpu.vector_store %arg6[%c0_8, %c0_9, %c0_10], %18 {strides = array<i32>} : memref<1x8x16xf32, #tpu.memory_space<vmem>>, vector<1x8x16xf32>,
    } else {
    }
    return
  }
  func.func @transform_0(%arg0: i32, %arg1: i32, %arg2: i32) -> (i32, i32, i32) {
    %c0_i32 = arith.constant 0 : i32
    %c0_i32_0 = arith.constant 0 : i32
    return %arg0, %arg1, %c0_i32 : i32, i32, i32
  }
  func.func @transform_1(%arg0: i32, %arg1: i32, %arg2: i32) -> (i32, i32, i32) {
    %c0_i32 = arith.constant 0 : i32
    %c0_i32_0 = arith.constant 0 : i32
    return %arg0, %arg2, %c0_i32 : i32, i32, i32
  }
  func.func @transform_2(%arg0: i32, %arg1: i32, %arg2: i32) -> (i32, i32) {
    %c0_i32 = arith.constant 0 : i32
    %c0_i32_0 = arith.constant 0 : i32
    %c0_i32_1 = arith.constant 0 : i32
    return %c0_i32, %c0_i32_0 : i32, i32
  }
  func.func @transform_3(%arg0: i32, %arg1: i32, %arg2: i32) -> (i32, i32, i32) {
    %c0_i32 = arith.constant 0 : i32
    %c0_i32_0 = arith.constant 0 : i32
    return %arg0, %arg1, %c0_i32 : i32, i32, i32
  }
}

</mosaic_0001>

<bundles_post_ra>
// kernel: tpu_custom_call.1
= control target key start
LH: loop header
LB: loop body
LE: loop exit
PB: predicated region body
PF: predicated region fallthrough
CT: control target
= control target key end

     0   :  { %s1474_s0 = inlined_call_operand.hbm [shape: f32[2,8,32], index: 0, kind: input, shape index: {}]   ;;  %s1475_s1 = inlined_call_operand.hbm [shape: f32[2,8,32], index: 1, kind: input, shape index: {}]   ;;  %s1476_s2 = inlined_call_operand.hbm [shape: f32[32,48], index: 2, kind: input, shape index: {}]   ;;  %s1477_s3 = inlined_call_operand.hbm [shape: f32[2,8,16], index: 3, kind: output, shape index: {}]  }
   0x1   :  { %1483 = sst [smem:[#allocation18_spill]] %s1476_s2 }
   0x2   :  { %8 = vsyncpa [#allocation7], 0 }
   0x3   :  { %10 = vsyncpa [#allocation7 + $0x1], 0 }
   0x4   :  { %11 = vsyncpa [#allocation10], 0 }
   0x5   :  { %13 = vsyncpa [#allocation10 + $0x1], 0 }
   0x6   :  { %14 = vsyncpa [#allocation8], 0 }
   0x7   :  { %16 = vsyncpa [#allocation8 + $0x1], 0  ;;  %s1197_s12 = smov 0   ;;  %s1199_s13 = smov 0  }
   0x8   :  { %s1201_s14 = smov 0   ;;  %s1203_s15 = smov 0  }
   0x9   :  { %s1205_s16 = smov 0   ;;  %s1207_s17 = smov 0  }
   0xa LB: > { %s1228_s18 = sadd.s32 4294967295, %s1163_s17   ;;  %s801_s19 = sadd.s32 4294967294, %s1163_s17   ;;  %s1163_s17 = sphi %s1207_s17, %s22_s17   ;;  %s1159_s16 = sphi %s1205_s16, %s1506_s16   ;;  %s1155_s15 = sphi %s1203_s15, %s1505_s15   ;;  %s1151_s14 = sphi %s1201_s14, %s1504_s14   ;;  %s1147_s13 = sphi %s1199_s13, %s1503_s13   ;;  %s1143_s12 = sphi %s1197_s12, %s1502_s12  }
   0xb   : > { %p63_p0 = scmp.ne.s32.totalorder %s1147_s13, %s1143_s12  ;;  %p1478_p1 = scmp.eq.s32.totalorder %s1228_s18, 0 }
   0xc   : > { %p144_p3 = scmp.eq.s32.totalorder %s801_s19, 1  ;;  %p802_p5 = scmp.ge.s32.totalorder %s1163_s17, 1 }
   0xd   : > { %p1237_p4 = por %p1478_p1, %p63_p0  ;;  %p151_p7 = scmp.lt.s32.totalorder %s1163_s17, 3 }
   0xe   : > { %p1242_p6 = por %p144_p3, %p63_p0  ;;  %s1165_s23 = smov [#allocation11]  }
   0xf   : > { %s1484_s20 = scalar_select %p1237_p4, 1, 0 }
  0x10   : > { %s1485_s21 = scalar_select %p1242_p6, 1, 0 }
  0x11   : > { %p1247_p8 = pnand %p802_p5, %p151_p7  ;;  %s163_s24 = sshll.u32 %s1165_s23, 4  ;;  %s164_s24 = int_to_ptr.vmem [resolvable:$true] %s163_s24 }
  0x12   : > { %s41_s26 = sadd.s32 1, %s1159_s16  ;;  %s1488_s2 = sld [smem:[#allocation18_spill]] }
  0x13   : > { %s1486_s22 = scalar_select %p1247_p8, 1, 0 }
  0x14   : > { %p891_p9 = pneg %p1247_p8 }
  0x16   : > { %p1256_p11 = pnand %p891_p9, %p1478_p1 }
  0x18   : > { %s985_s29 = scalar_lea.hbm %s1488_s2, 512  ;;  %p987_p13 = pneg %p1256_p11 }
  0x19   : > { %p986_p12 = scmp.ne.s32.totalorder %s1488_s2, %s985_s29  ;;  %p992_p5 = scmp.lt.u32.totalorder %s985_s29, %s1488_s2 }
  0x1b   : > { %p988_p0 = pnand %p987_p13, %p986_p12 }
  0x1d   : > { %p989_p3 = pneg %p988_p0 }
  0x1f   : > { %p994_p7 = pnand %p992_p5, %p989_p3 }
  0x21   : > { %997 = shalt.err (!%p994_p7)
}
  0x22   : > { %s998_s7 = scalar_lea.vmem %s164_s24, 512  ;;  %p1006_p2 = scmp.lt.s32.totalorder %s164_s24, %s164_s24 }
  0x23   : > { %p999_p9 = scmp.ne.s32.totalorder %s164_s24, %s998_s7  ;;  %p1007_p6 = scmp.lt.s32.totalorder %s998_s7, %s998_s7 }
  0x25   : > { %p1001_p10 = pnand %p999_p9, %p987_p13  ;;  %p1008_p4 = por %p1007_p6, %p1006_p2 }
  0x27   : > { %p1002_p1 = pneg %p1001_p10 }
  0x29   : > { %p1009_p8 = pnand %p1008_p4, %p1002_p1 }
  0x2b   : > { %1012 = shalt.err (!%p1009_p8)
}
  0x2c   : > { %s1166_s8 = smov 128   ;;  %s1167_s9 = smov 8  }
  0x2d   : > { %894 = dma.hbm_to_vmem [thread:$0]  (!%p1256_p11), %s1488_s2, 512, %s164_s24, [#allocation10], %s1166_s8, %s1166_s8, %s1167_s9  }
  0x2e   : > { %p43_p1 = scmp.ge.s32.totalorder %s41_s26, 2  ;;  %s50_s19 = sadd.s32 1, %s1151_s14 }
  0x2f   : > { %p57_p2 = scmp.ne.s32.totalorder %s1151_s14, %s1147_s13  ;;  %p58_p4 = scmp.eq.s32.totalorder %s1163_s17, 0 }
  0x30   : > { %s1508_s26 = smov (%p43_p1, %s41_s26), 0  ;;  %p1491_p8 = scmp.eq.s32.totalorder %s1228_s18, 1 }
  0x31   : > { %1489 = sst [smem:[#allocation17_spill]] %s1508_s26  ;;  %p1283_p6 = por %p58_p4, %p57_p2 }
  0x32   : > { %p1289_p10 = por %p1491_p8, %p57_p2  ;;  %s45_s27 = ssub.s32 %s1159_s16, %s1508_s26 }
  0x33   : > { %p907_p11 = scmp.lt.s32.totalorder %s1163_s17, 2  ;;  %p48_p12 = scmp.eq.s32.totalorder %s45_s27, 0 }
  0x34   : > { %s1492_s25 = scalar_select %p1289_p10, 1, 0 }
  0x35   : > { %s177_s24 = sand.u32 1, %s1151_s14   ;;  %s806_s30 = sshll.u32 %s1159_s16, 7 }
  0x36   : > { %s1297_s28 = sshll.u32 %s177_s24, 3  ;;  %s1306_s6 = scalar_lea.hbm %s1474_s0, %s806_s30 }
  0x37   : > { %s1300_s29 = scalar_select %p48_p12, %s1151_s14, %s50_s19  }
  0x38   : > { %s181_s7 = scalar_lea.vmem [#allocation6], %s1297_s28  ;;  %p1313_p13 = pnand %p907_p11, %p1283_p6 }
  0x39   : > { %s189_s8 = sshll.u32 %s181_s7, 4  ;;  %s1320_s19 = scalar_lea.hbm %s1475_s1, %s806_s30  ;;  %s1309_s8 = int_to_ptr.vmem [resolvable:$true] %s189_s8 }
  0x3a   : > { %s196_s27 = sand.u32 1, %s1163_s17   ;;  %s178_s4 = scalar_lea.sflag [#allocation7], %s177_s24 }
  0x3b   : > { %s1013_s5 = scalar_lea.hbm %s1306_s6, 128  ;;  %p1015_p3 = pneg %p1313_p13 }
  0x3c   : > { %p1014_p0 = scmp.ne.s32.totalorder %s1306_s6, %s1013_s5  ;;  %s1018_s2 = scalar_lea.hbm %s1474_s0, 256 }
  0x3d   : > { %p1019_p9 = scmp.lt.u32.totalorder %s1306_s6, %s1474_s0  ;;  %p1020_p1 = scmp.lt.u32.totalorder %s1018_s2, %s1013_s5 }
  0x3e   : > { %p1016_p5 = pnand %p1015_p3, %p1014_p0  ;;  %p1022_p4 = scmp.lt.u32.totalorder %s1013_s5, %s1306_s6 }
  0x3f   : > { %p1021_p2 = por %p1020_p1, %p1019_p9 }
  0x40   : > { %p1017_p7 = pneg %p1016_p5 }
  0x41   : > { %p1023_p6 = por %p1022_p4, %p1021_p2 }
  0x43   : > { %p1024_p8 = pnand %p1023_p6, %p1017_p7 }
  0x45   : > { %1027 = shalt.err (!%p1024_p8)
}
  0x46   : > { %s1028_s24 = scalar_lea.vmem %s1309_s8, 128  ;;  %s1168_s30 = smov [#allocation6]  }
  0x47   : > { %p1029_p11 = scmp.ne.s32.totalorder %s1309_s8, %s1028_s24  ;;  %s1033_s11 = sshll.u32 %s1168_s30, 4  ;;  %s1034_s11 = int_to_ptr.vmem [resolvable:$false] %s1033_s11 }
  0x48   : > { %s1035_s26 = scalar_lea.vmem %s1034_s11, 256  ;;  %p1036_p5 = scmp.lt.s32.totalorder %s1309_s8, %s1034_s11 }
  0x49   : > { %p1031_p12 = pnand %p1029_p11, %p1015_p3  ;;  %p1037_p9 = scmp.lt.s32.totalorder %s1035_s26, %s1028_s24 }
  0x4b   : > { %p1032_p0 = pneg %p1031_p12  ;;  %p1038_p1 = por %p1037_p9, %p1036_p5 }
  0x4d   : > { %p1039_p2 = pnand %p1038_p1, %p1032_p0 }
  0x4f   : > { %1042 = shalt.err (!%p1039_p2)
}
  0x50   : > { %898 = dma.hbm_to_vmem [thread:$0]  (!%p1313_p13), %s1306_s6, 128, %s1309_s8, %s178_s4  }
  0x51   : > { %s200_s2 = scalar_lea.vmem [#allocation9], %s1297_s28  ;;  %s197_s23 = scalar_lea.sflag [#allocation10], %s196_s27 }
  0x52   : > { %s208_s5 = sshll.u32 %s200_s2, 4  ;;  %s1043_s7 = scalar_lea.hbm %s1320_s19, 128  ;;  %s209_s5 = int_to_ptr.vmem [resolvable:$true] %s208_s5 }
  0x53   : > { %p1044_p7 = scmp.ne.s32.totalorder %s1320_s19, %s1043_s7  ;;  %s1048_s30 = scalar_lea.hbm %s1475_s1, 256 }
  0x54   : > { %p1049_p8 = scmp.lt.u32.totalorder %s1320_s19, %s1475_s1  ;;  %p1050_p11 = scmp.lt.u32.totalorder %s1048_s30, %s1043_s7 }
  0x55   : > { %p1046_p4 = pnand %p1044_p7, %p1015_p3  ;;  %p1052_p0 = scmp.lt.u32.totalorder %s1043_s7, %s1320_s19 }
  0x56   : > { %p1051_p12 = por %p1050_p11, %p1049_p8 }
  0x57   : > { %p1047_p6 = pneg %p1046_p4 }
  0x58   : > { %p1053_p5 = por %p1052_p0, %p1051_p12 }
  0x5a   : > { %p1054_p9 = pnand %p1053_p5, %p1047_p6 }
  0x5c   : > { %1057 = shalt.err (!%p1054_p9)
}
  0x5d   : > { %s1058_s28 = scalar_lea.vmem %s209_s5, 128  ;;  %s1169_s6 = smov [#allocation9]  }
  0x5e   : > { %p1059_p1 = scmp.ne.s32.totalorder %s209_s5, %s1058_s28  ;;  %s1063_s8 = sshll.u32 %s1169_s6, 4  ;;  %s1064_s8 = int_to_ptr.vmem [resolvable:$false] %s1063_s8 }
  0x5f   : > { %s1065_s27 = scalar_lea.vmem %s1064_s8, 256  ;;  %p1066_p4 = scmp.lt.s32.totalorder %s209_s5, %s1064_s8 }
  0x60   : > { %p1061_p2 = pnand %p1059_p1, %p1015_p3  ;;  %p1067_p10 = scmp.lt.s32.totalorder %s1065_s27, %s1058_s28 }
  0x62   : > { %p1062_p7 = pneg %p1061_p2  ;;  %p1068_p8 = por %p1067_p10, %p1066_p4 }
  0x64   : > { %p1069_p11 = pnand %p1068_p8, %p1062_p7 }
  0x66   : > { %1072 = shalt.err (!%p1069_p11)
}
  0x67   : > { %901 = dma.hbm_to_vmem [thread:$0]  (!%p1313_p13), %s1320_s19, 128, %s209_s5, %s197_s23  }
  0x68   : > { %p1494_p6 = scmp.ne.s32.totalorder %s1486_s22, 0 }
  0x69   : > { %s1373_s4 = sand.u32 (!%p1494_p6), 1, %s1147_s13   ;;  %p1495_p10 = scmp.ne.s32.totalorder (!%p1494_p6), %s1484_s20, 0 }
  0x6a   : > { %217 = sbr.rel (%p1494_p6) target bundleno = 1273 (0x4f9), region = 32  ;;  %s1376_s2 = sshll.u32 (!%p1494_p6), %s1373_s4, 3 }
  0x6b   : > { %s220_s7 = scalar_lea.sflag (!%p1494_p6), [#allocation7], %s1373_s4  ;;  %s223_s10 = scalar_lea.vmem (!%p1494_p6), [#allocation6], %s1376_s2 }
  0x71   : > { %1126 = dma.done.wait (%p1495_p10), %s220_s7, 128  }
  0x72   : > { %1128 = vsyncadd (%p1495_p10), %s220_s7, 4294967168  ;;  %s228_s22 = sand.u32 1, %s1228_s18   ;;  %s232_s19 = scalar_lea.vmem [#allocation9], %s1376_s2 }
  0x73   : > { %s229_s9 = scalar_lea.sflag [#allocation10], %s228_s22 }
  0x74   : > { %1130 = dma.done.wait (%p1495_p10), %s229_s9, 128  }
  0x75   : > { %1132 = vsyncadd (%p1495_p10), %s229_s9, 4294967168  ;;  %p1496_p13 = scmp.eq.s32.totalorder %s1228_s18, 0 }
  0x77   : > { %1134 = dma.done.wait (%p1496_p13), [#allocation10], 512   ;;  %p1497_p3 = pmov %p1496_p13 }
  0x78   : > { %v1170_v0 = vmov 0.0|0.0   ;;  %vm1171_vm0 = vmmov 0   ;;  %v1172_v1 = vmov 0.0   ;;  %v362_v2 = vld [vmem:[#allocation11] sm:$0xff]  ;;  %v363_v3 = vld [vmem:[#allocation11 + $0x8] sm:$0xff]  ;;  %v364_v4 = vld [vmem:[#allocation11 + $0x10] sm:$0xff]  ;;  %v534_v28 = vlaneseq }
  0x79   : > { %1136 = vsyncadd (%p1497_p3), [#allocation10], 4294966784  ;;  %869 = vmatprep.subr.bf16.mxu0 %v1170_v0  ;;  %845 = vmatprep.mubr.msk.f32.mxu0 %vm1171_vm0, %v1172_v1  ;;  %v967_v5 = vpack.i.bf16 %v363_v3, %v362_v2  ;;  %v365_v6 = vld [vmem:[#allocation11 + $0x18] sm:$0xff]  ;;  %v870_v7 = vpack.c.bf16 %v363_v3, %v362_v2  ;;  %vm271_vm1 = vcmask 130048   ;;  %s1173_s18 = smov 112   ;;  %v273_v10 = vld [vmem:[%s223_s10] sm:$0xff] }
  0x7a   : > { %875 = vmatprep.subr.bf16.mxu1 %v1170_v0  ;;  %856 = vmatprep.mubr.msk.f32.mxu1 %vm1171_vm0, %v1172_v1  ;;  %272 = vst.msk [vmem:[#allocation4] sm:$0xff] %vm271_vm1, %v1172_v1  ;;  %v972_v8 = vpack.i.bf16 %v365_v6, %v364_v4  ;;  %v873_v9 = vpack.c.bf16 %v365_v6, %v364_v4  ;;  %vm278_vm2 = vcmask 261120   ;;  %v361_v19 = vld [vmem:[%s232_s19] sm:$0xff]  ;;  %vm268_vm3 = vcmask 7168   ;;  %s820_s20 = sshll.u32 %s1155_s15, 7  ;;  %s263_s5 = scalar_lea.vmem [#allocation12], %s1376_s2 }
  0x7b   : > { %968 = vrot.lane.b32.xlu0 %v967_v5, %s1173_s18  ;;  %871 = vmatpush3.bf16.msra.mxu0 %v870_v7  ;;  %v1174_v26 = vmov -inf   ;;  %270 = vst.msk [vmem:[#allocation3] sm:$0xff] %vm268_vm3, %v1172_v1  ;;  %v535_v29 = vshrl.u32 %v534_v28, 7  ;;  %v539_v30 = vand.u32 127, %v534_v28  ;;  %vm545_vm5 = vcmask 64512   ;;  %s684_s23 = sshll.u32 %s263_s5, 4  ;;  %s1424_s11 = scalar_lea.hbm %s1477_s3, %s820_s20  ;;  %s1426_s23 = int_to_ptr.vmem [resolvable:$true] %s684_s23 }
  0x7c   : > { %872 = vmatprep.subr.bf16.mxu0 %v1170_v0  ;;  %269 = vst.msk [vmem:[#allocation2] sm:$0xff] %vm268_vm3, %v1174_v26  ;;  %v1175_v35 = vmov 0   ;;  %s670_s26 = scalar_lea.sflag [#allocation8], %s1373_s4  ;;  %s1073_s28 = scalar_lea.vmem %s1426_s23, 128 }
  0x7d   : > { %vm542_vm4 = vcmp.le.s32.totalorder %v539_v30, %v535_v29  ;;  %977 = vset.pattern.permute.xlu1 %v1175_v35  ;;  %978 = vset.pattern.permute.xlu0 %v1175_v35  ;;  %p1074_p12 = scmp.ne.s32.totalorder %s1426_s23, %s1073_s28  ;;  %p1498_p0 = scmp.ne.s32.totalorder %s1492_s25, 0 }
  0x7e   : > { %s1176_s15 = smov [#allocation12]  }
  0x7f   : > { %973 = vrot.lane.b32.xlu0 %v972_v8, %s1173_s18  ;;  %874 = vmatpush3.bf16.msra.mxu0 %v873_v9  ;;  %p1075_p5 = pnand %p1074_p12, %p1498_p0  ;;  %s1077_s6 = sshll.u32 %s1176_s15, 4  ;;  %s1078_s6 = int_to_ptr.vmem [resolvable:$false] %s1077_s6 }
  0x80   : > { %859 = vmatprep.subr.mxu0 %v1172_v1  ;;  %s1079_s8 = scalar_lea.vmem %s1078_s6, 256  ;;  %p1080_p1 = scmp.lt.s32.totalorder %s1426_s23, %s1078_s6 }
  0x81   : > { %v569_v52 = vld [vmem:[#allocation4] sm:$0xff]  ;;  %p1076_p9 = pneg %p1075_p5  ;;  %p1081_p2 = scmp.lt.s32.totalorder %s1079_s8, %s1073_s28 }
  0x82   : > { %846 = vmatmul.mubr.msk.f32.vlgmr.msra.gmra.mrb[0].mxu0 %vm278_vm2, %v273_v10  ;;  %v561_v47 = vld [vmem:[#allocation3] sm:$0xff] }
  0x83   : > { %861 = vmatprep.mubr.msk.f32.mxu0 %vm1171_vm0, %v1172_v1  ;;  %v544_v36 = vld [vmem:[#allocation2] sm:$0xff]  ;;  %p1082_p7 = por %p1081_p2, %p1080_p1 }
  0x85   : > { %p1083_p4 = pnand %p1082_p7, %p1076_p9 }
  0xed   : > { %v969_v11 = vpop.permute.xlu0 %968 }
  0xee   : > { %v971_v12 = vunpack.i.h.bf16 %v969_v11  ;;  %v970_v13 = vunpack.i.l.bf16 %v969_v11 }
  0xf0   : > { %v876_v14 = vpack.c.bf16 %v971_v12, %v970_v13 }
  0xf1   : > { %v974_v15 = vpop.permute.xlu0 %973 }
  0xf2   : > { %v976_v16 = vunpack.i.h.bf16 %v974_v15  ;;  %v975_v17 = vunpack.i.l.bf16 %v974_v15  ;;  %877 = vmatpush3.bf16.msra.mxu1 %v876_v14 }
  0xf3   : > { %878 = vmatprep.subr.bf16.mxu1 %v1170_v0 }
  0xf4   : > { %v879_v18 = vpack.c.bf16 %v976_v16, %v975_v17 }
  0xf6   : > { %880 = vmatpush3.bf16.msra.mxu1 %v879_v18 }
  0xf7   : > { %864 = vmatprep.subr.mxu1 %v1172_v1 }
  0xf9   : > { %857 = vmatmul.mubr.msk.f32.vlgmr.msra.gmra.mrb[0].mxu1 %vm278_vm2, %v361_v19 }
  0xfa   : > { %866 = vmatprep.mubr.msk.f32.mxu1 %vm1171_vm0, %v1172_v1 }
 0x155   : > { %v348_v20 = vpop.f32.mrb[0].mxu0 }
 0x156   : > { %v352_v21 = vmul.f32 0.17677669, %v348_v20  ;;  %v847_v22 = vpop.f32.mrb[1].mxu0 }
 0x158   : > { %353 = vst.msk [vmem:[#allocation5] sm:$0xff] %vm271_vm1, %v352_v21 }
 0x15f   : > { %v456_v25 = vld [vmem:[#allocation5] sm:$0xff] }
 0x1cc   : > { %v452_v23 = vpop.f32.mrb[0].mxu1 }
 0x1cd   : > { %576 = vrot.lane.b32.xlu0 %v452_v23, %s1173_s18  ;;  %v858_v24 = vpop.f32.mrb[1].mxu1  ;;  %860 = vmatpush3.xpose.msk.msra.mxu0 %vm271_vm1, %v452_v23 }
 0x1d0   : > { %862 = vmatmul.mubr.msk.f32.vlgmr.msra.gmra.mrb[2].mxu0 %vm271_vm1, %v456_v25 }
 0x23f   : > { %v577_v27 = vpop.permute.xlu0 %576 }
 0x240   : > { %865 = vmatpush3.msra.mxu1 %v577_v27 }
 0x2a3   : > { %v530_v31 = vpop.f32.mrb[2].mxu0 }
 0x2a4   : > { %v543_v32 = vsel %vm542_vm4, %v530_v31, -inf  ;;  %v863_v33 = vpop.f32.mrb[3].mxu0 }
 0x2a5   : > { %v546_v34 = vsel %vm545_vm5, %v543_v32, -inf }
 0x2a6   : > { %547 = vmax.xlane.f32.xlu1 %v546_v34 }
 0x333   : > { %v548_v37 = vpop.xlane.xlu1 %547 }
 0x334   : > { %v549_v38 = vmax.f32 %v544_v36, %v548_v37 }
 0x336   : > { %v550_v39 = vsub.f32 %v544_v36, %v549_v38  ;;  %654 = vst.msk [vmem:[#allocation2] sm:$0xff] %vm268_vm3, %v549_v38  ;;  %555 = vperm.xlu1 %977, %v549_v38  }
 0x338   : > { %v551_v40 = vmul.f32 1.442695, %v550_v39 }
 0x33a   : > { %979 = vpow2.f32 %v551_v40 }
 0x344   : > { %v980_v41 = vpop.eup %979 }
 0x345   : > { %572 = vperm.xlu1 %977, %v980_v41   ;;  %v562_v48 = vmul.f32 %v980_v41, %v561_v47 }
 0x3b5   : > { %v556_v42 = vpop.permute.xlu1 %555 }
 0x3b6   : > { %v558_v43 = vsub.f32 %v543_v32, %v556_v42 }
 0x3b8   : > { %v559_v44 = vmul.f32 1.442695, %v558_v43 }
 0x3ba   : > { %981 = vpow2.f32 %v559_v44 }
 0x3c4   : > { %v982_v45 = vpop.eup %981  ;;  %v573_v53 = vpop.permute.xlu1 %572 }
 0x3c5   : > { %867 = vmatmul.mubr.msk.f32.vlgmr.msra.gmra.mrb[2].mxu1 %vm545_vm5, %v982_v45  ;;  %v563_v46 = vsel %vm545_vm5, %v982_v45, 0.0  ;;  %v575_v54 = vmul.f32 %v573_v53, %v569_v52 }
 0x3c6   : > { %564 = vadd.xlane.f32.xlu0 %v563_v46 }
 0x453   : > { %v565_v49 = vpop.xlane.xlu0 %564 }
 0x454   : > { %v566_v50 = vadd.f32 %v565_v49, %v562_v48 }
 0x456   : > { %568 = vst.msk [vmem:[#allocation3] sm:$0xff] %vm268_vm3, %v566_v50 }
 0x45d   : > { %v659_v51 = vld [vmem:[#allocation3] sm:$0xff] }
 0x45e   : > { %662 = vperm.xlu1 %977, %v659_v51  }
 0x498   : > { %v648_v55 = vpop.f32.mrb[2].mxu1 }
 0x499   : > { %v652_v56 = vadd.f32 %v648_v55, %v575_v54  ;;  %v868_v57 = vpop.f32.mrb[3].mxu1 }
 0x49b   : > { %653 = vst.msk [vmem:[#allocation4] sm:$0xff] %vm271_vm1, %v652_v56 }
 0x4a2   : > { %v658_v60 = vld [vmem:[#allocation4] sm:$0xff] }
 0x4dd   : > { %v663_v58 = vpop.permute.xlu1 %662 }
 0x4de   : > { %983 = vrcp.f32 %v663_v58 }
 0x4e8   : > { %v984_v59 = vpop.eup %983 }
 0x4e9   : > { %v666_v61 = vmul.f32 %v984_v59, %v658_v60 }
 0x4eb   : > { %668 = vst.msk [vmem:[%s263_s5] sm:$0xff] %vm271_vm1, %v666_v61 }
 0x4ec   : > { %1086 = shalt.err (!%p1083_p4)
}
 0x4ed   : > { %s1087_s27 = scalar_lea.hbm %s1424_s11, 128  ;;  %s1091_s7 = scalar_lea.hbm %s1477_s3, 256 }
 0x4ee   : > { %p1088_p8 = scmp.ne.s32.totalorder %s1424_s11, %s1087_s27  ;;  %p1092_p10 = scmp.lt.u32.totalorder %s1424_s11, %s1477_s3 }
 0x4ef   : > { %p1093_p13 = scmp.lt.u32.totalorder %s1091_s7, %s1087_s27  ;;  %p1095_p12 = scmp.lt.u32.totalorder %s1087_s27, %s1424_s11 }
 0x4f0   : > { %p1089_p11 = pnand %p1088_p8, %p1498_p0 }
 0x4f1   : > { %p1094_p3 = por %p1093_p13, %p1092_p10 }
 0x4f2   : > { %p1090_p6 = pneg %p1089_p11 }
 0x4f3   : > { %p1096_p5 = por %p1095_p12, %p1094_p3 }
 0x4f5   : > { %p1097_p9 = pnand %p1096_p5, %p1090_p6 }
 0x4f7   : > { %1100 = shalt.err (!%p1097_p9)
}
 0x4f8   : > { %889 = dma.vmem_to_hbm [thread:$0]  (%p1498_p0), %s1426_s23, 128, %s1424_s11, %s670_s26  }
 0x4f9 PF: > { %s696_s9 = sand.u32 1, %s1143_s12   ;;  %p1499_p1 = scmp.ne.s32.totalorder %s1485_s21, 0 }
 0x4fa   : > { %p1500_p2 = scmp.ge.s32.totalorder %s1163_s17, 2  ;;  %s697_s19 = scalar_lea.sflag [#allocation8], %s696_s9 }
 0x4fc   : > { %p903_p7 = pnand %p1500_p2, %p1499_p1 }
 0x4fe   : > { %1138 = dma.done.wait (!%p903_p7), %s697_s19, 128  }
 0x4ff   : > { %1140 = vsyncadd (!%p903_p7), %s697_s19, 4294967168  ;;  %s22_s17 = sadd.s32 1, %s1163_s17   ;;  %s1501_s25 = sld [smem:[#allocation17_spill]] }
 0x500   : > { %p19_p4 = scmp.ge.s32.totalorder %s22_s17, 4   ;;  %s1502_s12 = smov %s1147_s13 }
 0x501   : > { %s1503_s13 = smov %s1151_s14  ;;  %s1504_s14 = smov %s1300_s29 }
 0x502   : > { %s1505_s15 = smov %s1159_s16  ;;  %21 = sbr.rel (!%p19_p4) target bundleno = 10 (0xa), region = 106 }
 0x505   : > { %s1506_s16 = smov %s1501_s25 }
 0x509   :  { %702 = vsyncpa [#allocation7], 1 }
 0x50a   :  { %704 = vsyncpa [#allocation7 + $0x1], 1 }
 0x50b   :  { %705 = vsyncpa [#allocation10], 1 }
 0x50c   :  { %707 = vsyncpa [#allocation10 + $0x1], 1 }
 0x50d   :  { %708 = vsyncpa [#allocation8], 1 }
 0x50e   :  { %710 = vsyncpa [#allocation8 + $0x1], 1 }

</bundles_post_ra>
